<compile_context>
chip_gen: v7x
topology: tpu7x:2x2x1
jax: 0.10.0
libtpu: 0.0.40
codegen_flags: <defaults>
</compile_context>

<pallas_src>
import jax
import jax.numpy as jnp
from jax.experimental import pallas as pl
from jax.experimental.pallas import tpu as pltpu


def _cdiv(a, b):
    return -(-a // b)


def _round_up(a, b):
    return _cdiv(a, b) * b


def _lora_merged_kernel(x_ref, w_ref, o_ref):
    # x_ref: (C_in, TL), w_ref: (C_out, C_in) = scale * (Wu @ Wd), o_ref: (C_out, TL)
    o_ref[...] = jnp.dot(
        w_ref[...], x_ref[...], preferred_element_type=jnp.float32
    ).astype(o_ref.dtype)


def _lora_two_matmul_kernel(x_ref, wd_ref, wu_ref, o_ref):
    # x_ref: (C_in, TL), wd_ref: (rank, C_in), wu_ref: (C_out, rank) (scale pre-folded)
    down = jnp.dot(wd_ref[...], x_ref[...], preferred_element_type=jnp.float32)
    up = jnp.dot(wu_ref[...], down.astype(wu_ref.dtype),
                 preferred_element_type=jnp.float32)
    o_ref[...] = up.astype(o_ref.dtype)


def lora_conv2d_forward(x_nchw, down_w, up_w, network_alpha=None, *, rank=None,
                        max_lane_tile=2048):
    """x_nchw: (N, C_in, H, W); down_w: (rank, C_in, 1, 1); up_w: (C_out, rank, 1, 1)."""
    orig_dtype = x_nchw.dtype
    weight_dtype = down_w.dtype

    N, C_in, H, W = x_nchw.shape
    r, _, kh, kw = down_w.shape
    C_out = up_w.shape[0]
    assert (kh, kw) == (1, 1), "only the module-default 1x1 / stride-1 conv is implemented"
    if rank is None:
        rank = r
    scale = float(network_alpha) / float(rank) if network_alpha is not None else 1.0

    wd = down_w.reshape(r, C_in)          # (rank, C_in)
    wu = up_w.reshape(C_out, r)           # (C_out, rank)

    HW = H * W
    # Channels on sublanes, pixels on lanes: no data transposes around the kernel.
    x = x_nchw.reshape(N, C_in, HW).astype(weight_dtype)

    # Merge the two rank-r matmuls into one (C_out, C_in) matmul when the merged
    # weight costs no more MXU tiles than the two (rank-padded) factors.
    t_in, t_out = _cdiv(C_in, 128), _cdiv(C_out, 128)
    merged = (t_in * t_out) <= (t_in + t_out)

    # Lane-tile selection: the op is HBM-bound, so take the biggest tile fitting a
    # ~20 MiB double-buffered budget (within the scoped VMEM we request below).
    in_bpe = jnp.dtype(weight_dtype).itemsize
    out_bpe = jnp.dtype(orig_dtype).itemsize
    per_col = 2 * (C_in * in_bpe + C_out * out_bpe)      # double-buffered in + out tiles
    budget = 20 << 20
    tl = min(max_lane_tile, max(128, (budget // per_col) // 128 * 128))
    tl = min(tl, _round_up(HW, 128))
    # Keep at least 2 grid steps so both TensorCores get work on v7x.
    if N * _cdiv(_round_up(HW, 128), tl) < 2 and tl > 128:
        tl = max(128, _round_up(_cdiv(tl, 2), 128))
    hw_pad = _round_up(HW, tl)
    if hw_pad != HW:
        x = jnp.pad(x, ((0, 0), (0, 0), (0, hw_pad - HW)))

    grid = (N, hw_pad // tl)
    x_spec = pl.BlockSpec((None, C_in, tl), lambda n, j: (n, 0, j))
    o_spec = pl.BlockSpec((None, C_out, tl), lambda n, j: (n, 0, j))
    compiler_params = pltpu.CompilerParams(
        dimension_semantics=("parallel", "parallel"),
        vmem_limit_bytes=32 << 20,
    )
    out_shape = jax.ShapeDtypeStruct((N, C_out, hw_pad), orig_dtype)

    if merged:
        # Fold both factors and the LoRA scale into one matrix in the wrapper.
        w_eff = (scale * jnp.dot(wu.astype(jnp.float32), wd.astype(jnp.float32))
                 ).astype(weight_dtype)                  # (C_out, C_in)
        out = pl.pallas_call(
            _lora_merged_kernel,
            out_shape=out_shape,
            grid_spec=pltpu.PrefetchScalarGridSpec(
                num_scalar_prefetch=0,
                grid=grid,
                in_specs=[x_spec,
                          pl.BlockSpec((C_out, C_in), lambda n, j: (0, 0))],
                out_specs=o_spec,
            ),
            compiler_params=compiler_params,
        )(x, w_eff)
    else:
        wd_k = wd.astype(weight_dtype)
        wu_k = (scale * wu.astype(jnp.float32)).astype(weight_dtype)
        out = pl.pallas_call(
            _lora_two_matmul_kernel,
            out_shape=out_shape,
            grid_spec=pltpu.PrefetchScalarGridSpec(
                num_scalar_prefetch=0,
                grid=grid,
                in_specs=[x_spec,
                          pl.BlockSpec((r, C_in), lambda n, j: (0, 0)),
                          pl.BlockSpec((C_out, r), lambda n, j: (0, 0))],
                out_specs=o_spec,
            ),
            compiler_params=compiler_params,
        )(x, wd_k, wu_k)

    return out[:, :, :HW].reshape(N, C_out, H, W)


def init_lora_conv2d_params(key, in_features, out_features, rank):
    """Init matching the module: down ~ N(0, (1/rank)^2), up = 0."""
    down_w = (jax.random.normal(key, (rank, in_features, 1, 1), dtype=jnp.float32)
              * (1.0 / rank))
    up_w = jnp.zeros((out_features, rank, 1, 1), dtype=jnp.float32)
    return down_w, up_w


def _ref_forward(x, down_w, up_w, network_alpha, rank):
    """Pure-JAX reference matching the PyTorch forward (1x1 convs)."""
    orig_dtype = x.dtype
    wdt = down_w.dtype
    N, C_in, H, W = x.shape
    r = down_w.shape[0]
    C_out = up_w.shape[0]
    xf = jnp.transpose(x.astype(wdt), (0, 2, 3, 1)).reshape(-1, C_in)
    y = (xf @ down_w.reshape(r, C_in).T) @ up_w.reshape(C_out, r).T
    if network_alpha is not None:
        y = y * (network_alpha / rank)
    return y.reshape(N, H, W, C_out).transpose(0, 3, 1, 2).astype(orig_dtype)


if __name__ == "__main__":
    key = jax.random.PRNGKey(0)
    k1, k2, k3, k4, k5, k6 = jax.random.split(key, 6)

    # --- Test 1: module-default small shapes (merged single-matmul path) ---
    N, C_in, H, W, C_out, rank = 2, 4, 16, 16, 8, 4
    alpha = 8.0
    x = jax.random.normal(k1, (N, C_in, H, W), dtype=jnp.float32)
    down_w = jax.random.normal(k2, (rank, C_in, 1, 1), dtype=jnp.float32) * (1.0 / rank)
    # Module init zeros `up`; use random weights here so the check is non-trivial.
    up_w = jax.random.normal(k3, (C_out, rank, 1, 1), dtype=jnp.float32) * 0.1

    out = jax.block_until_ready(
        lora_conv2d_forward(x, down_w, up_w, network_alpha=alpha, rank=rank))
    ref = _ref_forward(x, down_w, up_w, alpha, rank)
    assert out.shape == (N, C_out, H, W)
    assert out.dtype == x.dtype
    assert jnp.allclose(out, ref, atol=1e-5, rtol=1e-5)

    # --- Test 2: larger channel count exercising the two-matmul path ---
    N2, C_in2, H2, W2, C_out2, rank2 = 1, 384, 8, 8, 384, 4
    x2 = jax.random.normal(k4, (N2, C_in2, H2, W2), dtype=jnp.float32)
    down_w2 = jax.random.normal(k5, (rank2, C_in2, 1, 1), dtype=jnp.float32) * (1.0 / rank2)
    up_w2 = jax.random.normal(k6, (C_out2, rank2, 1, 1), dtype=jnp.float32) * 0.1
    out2 = jax.block_until_ready(
        lora_conv2d_forward(x2, down_w2, up_w2, network_alpha=None, rank=rank2))
    ref2 = _ref_forward(x2, down_w2, up_w2, None, rank2)
    assert out2.shape == (N2, C_out2, H2, W2)
    assert out2.dtype == x2.dtype
    assert jnp.allclose(out2, ref2, atol=1e-4, rtol=1e-4)

    print("KERNEL_OK")
</pallas_src>

<mosaic_0001>
module attributes {stable_mosaic.version = 11 : i64} {
  func.func @_lora_merged_kernel(%arg0: i32, %arg1: i32, %arg2: memref<1x4x256xf32, #tpu.memory_space<vmem>>, %arg3: memref<8x4xf32, #tpu.memory_space<vmem>>, %arg4: memref<1x8x256xf32, #tpu.memory_space<vmem>>) attributes {dimension_semantics = [#tpu.dimension_semantics<parallel>, #tpu.dimension_semantics<parallel>], iteration_bounds = array<i64: 2, 1>, scalar_prefetch = 0 : i64, scratch_operands = 0 : i64, tpu.core_type = #tpu.core_type<tc>, window_params = [{transform_indices = @transform_0, window_bounds = array<i64: 1, 4, 256>}, {pipeline_mode = #tpu.pipeline_mode<synchronous>, transform_indices = @transform_1, window_bounds = array<i64: 8, 4>}, {transform_indices = @transform_2, window_bounds = array<i64: 1, 8, 256>}]} {
    %c0 = arith.constant 0 : index
    %c0_0 = arith.constant 0 : index
    %0 = vector.load %arg3[%c0, %c0_0] : memref<8x4xf32, #tpu.memory_space<vmem>>, vector<8x4xf32>
    %c0_1 = arith.constant 0 : index
    %c0_2 = arith.constant 0 : index
    %c0_3 = arith.constant 0 : index
    %1 = vector.load %arg2[%c0_1, %c0_2, %c0_3] : memref<1x4x256xf32, #tpu.memory_space<vmem>>, vector<1x4x256xf32>
    %2 = vector.shape_cast %1 : vector<1x4x256xf32> to vector<4x256xf32>
    %cst = arith.constant dense<0.000000e+00> : vector<8x256xf32>
    %3 = tpu.matmul %0, %2, %cst {dimension_numbers = #tpu.dot_dimension_numbers<[1], [0], [0], [1], [0, 0, 1, 1], [], []>} : vector<8x4xf32>, vector<4x256xf32>, vector<8x256xf32> -> vector<8x256xf32>
    %c0_4 = arith.constant 0 : index
    %c0_5 = arith.constant 0 : index
    %c0_6 = arith.constant 0 : index
    %4 = vector.load %arg4[%c0_4, %c0_5, %c0_6] : memref<1x8x256xf32, #tpu.memory_space<vmem>>, vector<1x8x256xf32>
    %5 = vector.shape_cast %4 : vector<1x8x256xf32> to vector<8x256xf32>
    %6 = vector.shape_cast %3 : vector<8x256xf32> to vector<1x8x256xf32>
    tpu.vector_store %arg4[%c0_4, %c0_5, %c0_6], %6 {strides = array<i32>} : memref<1x8x256xf32, #tpu.memory_space<vmem>>, vector<1x8x256xf32>,
    return
  }
  func.func @transform_0(%arg0: i32, %arg1: i32) -> (i32, i32, i32) {
    %c0_i32 = arith.constant 0 : i32
    %c0_i32_0 = arith.constant 0 : i32
    return %arg0, %c0_i32, %arg1 : i32, i32, i32
  }
  func.func @transform_1(%arg0: i32, %arg1: i32) -> (i32, i32) {
    %c0_i32 = arith.constant 0 : i32
    %c0_i32_0 = arith.constant 0 : i32
    %c0_i32_1 = arith.constant 0 : i32
    return %c0_i32, %c0_i32_0 : i32, i32
  }
  func.func @transform_2(%arg0: i32, %arg1: i32) -> (i32, i32, i32) {
    %c0_i32 = arith.constant 0 : i32
    %c0_i32_0 = arith.constant 0 : i32
    return %arg0, %c0_i32, %arg1 : i32, i32, i32
  }
}

</mosaic_0001>

<bundles_post_ra>
// kernel: tpu_custom_call.1
= control target key start
LH: loop header
LB: loop body
LE: loop exit
PB: predicated region body
PF: predicated region fallthrough
CT: control target
= control target key end

     0   :  { %7 = vsyncpa [#allocation3], 0  ;;  %s759_s0 = inlined_call_operand.hbm [shape: f32[2,4,256], index: 0, kind: input, shape index: {}]   ;;  %s760_s1 = inlined_call_operand.vmem [shape: f32[8,4], index: 1, kind: input, shape index: {}]   ;;  %s761_s2 = inlined_call_operand.hbm [shape: f32[2,8,256], index: 2, kind: output, shape index: {}]  }
   0x1   :  { %9 = vsyncpa [#allocation3 + $0x1], 0 }
   0x2   :  { %10 = vsyncpa [#allocation4], 0 }
   0x3   :  { %12 = vsyncpa [#allocation4 + $0x1], 0  ;;  %s583_s9 = smov 0   ;;  %s585_s10 = smov 0  }
   0x4   :  { %s587_s11 = smov 0   ;;  %s589_s12 = smov 0  }
   0x5   :  { %s591_s13 = smov 0   ;;  %s593_s14 = smov 0  }
   0x6 LB: > { %s367_s15 = sadd.s32 4294967295, %s563_s14   ;;  %s368_s16 = sadd.s32 4294967294, %s563_s14   ;;  %s563_s14 = sphi %s593_s14, %s18_s14   ;;  %s559_s13 = sphi %s591_s13, %s777_s13   ;;  %s555_s12 = sphi %s589_s12, %s776_s12   ;;  %s551_s11 = sphi %s587_s11, %s775_s11   ;;  %s547_s10 = sphi %s585_s10, %s774_s10   ;;  %s543_s9 = sphi %s583_s9, %s773_s9  }
   0x7   : > { %s30_s17 = sadd.s32 1, %s559_s13  ;;  %s39_s18 = sadd.s32 1, %s551_s11 }
   0x8   : > { %p32_p0 = scmp.ge.s32.totalorder %s30_s17, 2  ;;  %p46_p1 = scmp.ne.s32.totalorder %s551_s11, %s547_s10 }
   0x9   : > { %p47_p2 = scmp.eq.s32.totalorder %s563_s14, 0  ;;  %p52_p3 = scmp.ne.s32.totalorder %s547_s10, %s543_s9 }
   0xa   : > { %s779_s17 = smov (%p32_p0, %s30_s17), 0  ;;  %p53_p5 = scmp.eq.s32.totalorder %s367_s15, 0 }
   0xb   : > { %p624_p4 = por %p47_p2, %p46_p1  ;;  %s34_s20 = ssub.s32 %s559_s13, %s779_s17 }
   0xc   : > { %p99_p6 = scmp.eq.s32.totalorder %s367_s15, 1  ;;  %p37_p7 = scmp.eq.s32.totalorder %s34_s20, 0 }
   0xd   : > { %p630_p8 = por %p53_p5, %p52_p3  ;;  %p105_p10 = scmp.eq.s32.totalorder %s368_s16, 1 }
   0xe   : > { %p634_p9 = por %p99_p6, %p46_p1  ;;  %p399_p13 = scmp.lt.s32.totalorder %s563_s14, 2 }
   0xf   : > { %s639_s23 = scalar_select %p37_p7, %s551_s11, %s39_s18  }
  0x10   : > { %s765_s22 = scalar_select %p634_p9, 1, 0 }
  0x11   : > { %p641_p11 = por %p105_p10, %p52_p3  ;;  %s128_s25 = sand.u32 1, %s551_s11  }
  0x12   : > { %s371_s26 = sshll.u32 %s128_s25, 3  ;;  %s385_s27 = sshll.u32 %s559_s13, 7 }
  0x13   : > { %s766_s24 = scalar_select %p641_p11, 1, 0 }
  0x14   : > { %s652_s30 = scalar_lea.hbm %s759_s0, %s385_s27  ;;  %s132_s3 = scalar_lea.vmem [#allocation2], %s371_s26 }
  0x15   : > { %s142_s4 = sshll.u32 %s132_s3, 4  ;;  %p658_p0 = pnand %p399_p13, %p624_p4  ;;  %s654_s4 = int_to_ptr.vmem [resolvable:$true] %s142_s4 }
  0x16   : > { %s129_s6 = scalar_lea.sflag [#allocation3], %s128_s25  ;;  %s451_s7 = scalar_lea.hbm %s652_s30, 128 }
  0x17   : > { %p452_p3 = scmp.ne.s32.totalorder %s652_s30, %s451_s7  ;;  %p453_p5 = pneg %p658_p0 }
  0x18   : > { %s456_s16 = scalar_lea.hbm %s759_s0, 256  ;;  %p457_p4 = scmp.lt.u32.totalorder %s652_s30, %s759_s0 }
  0x19   : > { %p454_p6 = pnand %p453_p5, %p452_p3  ;;  %p458_p10 = scmp.lt.u32.totalorder %s456_s16, %s451_s7 }
  0x1a   : > { %p460_p12 = scmp.lt.u32.totalorder %s451_s7, %s652_s30 }
  0x1b   : > { %p455_p7 = pneg %p454_p6  ;;  %p459_p13 = por %p458_p10, %p457_p4 }
  0x1d   : > { %p461_p1 = por %p460_p12, %p459_p13 }
  0x1f   : > { %p462_p2 = pnand %p461_p1, %p455_p7 }
  0x21   : > { %465 = shalt.err (!%p462_p2)
}
  0x22   : > { %s466_s20 = scalar_lea.vmem %s654_s4, 128  ;;  %s565_s25 = smov [#allocation2]  }
  0x23   : > { %p467_p3 = scmp.ne.s32.totalorder %s654_s4, %s466_s20  ;;  %s471_s26 = sshll.u32 %s565_s25, 4  ;;  %s472_s26 = int_to_ptr.vmem [resolvable:$false] %s471_s26 }
  0x24   : > { %s473_s27 = scalar_lea.vmem %s472_s26, 256  ;;  %p474_p9 = scmp.lt.s32.totalorder %s654_s4, %s472_s26 }
  0x25   : > { %p469_p6 = pnand %p467_p3, %p453_p5  ;;  %p475_p4 = scmp.lt.s32.totalorder %s473_s27, %s466_s20 }
  0x27   : > { %p470_p11 = pneg %p469_p6  ;;  %p476_p10 = por %p475_p4, %p474_p9 }
  0x29   : > { %p477_p12 = pnand %p476_p10, %p470_p11 }
  0x2b   : > { %480 = shalt.err (!%p477_p12)
}
  0x2c   : > { %394 = dma.hbm_to_vmem [thread:$0]  (!%p658_p0), %s652_s30, 128, %s654_s4, %s129_s6  }
  0x2d   : > { %p768_p1 = scmp.lt.s32.totalorder %s563_s14, 3  ;;  %p769_p2 = scmp.ge.s32.totalorder %s563_s14, 1 }
  0x2f   : > { %p148_p5 = pnand %p769_p2, %p768_p1 }
  0x30   : > { %s694_s28 = sand.u32 (!%p148_p5), 1, %s547_s10  }
  0x31   : > { %151 = sbr.rel (%p148_p5) target bundleno = 289 (0x121), region = 28  ;;  %s375_s29 = sshll.u32 (!%p148_p5), %s694_s28, 3 }
  0x32   : > { %s154_s3 = scalar_lea.sflag (!%p148_p5), [#allocation3], %s694_s28  ;;  %s157_s7 = scalar_lea.vmem (!%p148_p5), [#allocation2], %s375_s29 }
  0x38   : > { %534 = dma.done.wait (%p630_p8), %s154_s3, 128  }
  0x39   : > { %536 = vsyncadd (%p630_p8), %s154_s3, 4294967168  ;;  %v566_v0 = vmov 0.0   ;;  %v181_v1 = vld [vmem:[%s157_s7] sm:$0xff]  ;;  %vm188_vm0 = vcmask 1043456   ;;  %vm184_vm1 = vcmask 31744   ;;  %s376_s5 = sshll.u32 %s694_s28, 4 }
  0x3a   : > { %257 = vmatprep.mubr.f32.mxu0 %v566_v0  ;;  %v183_v2 = vcombine.high %v181_v1, %v181_v1  ;;  %v180_v3 = vld [vmem:[%s760_s1] sm:$0xff]  ;;  %s177_s21 = scalar_lea.vmem [#allocation5], %s376_s5  ;;  %s386_s8 = sshll.u32 %s555_s12, 8 }
  0x3b   : > { %s283_s6 = sshll.u32 %s177_s21, 4  ;;  %s712_s18 = scalar_lea.hbm %s761_s2, %s386_s8  ;;  %s707_s6 = int_to_ptr.vmem [resolvable:$true] %s283_s6 }
  0x3c   : > { %377 = vmatprep.subr.msk.mxu0 %vm188_vm0, %v183_v2  ;;  %s267_s19 = scalar_lea.sflag [#allocation4], %s694_s28  ;;  %s481_s20 = scalar_lea.vmem %s707_s6, 256 }
  0x3d   : > { %378 = vmatpush1.msk.msra.mxu0 %vm188_vm0, %v181_v1  ;;  %p482_p8 = scmp.ne.s32.totalorder %s707_s6, %s481_s20  ;;  %p770_p9 = scmp.ne.s32.totalorder %s765_s22, 0 }
  0x3e   : > { %379 = vmatmul.mubr.msk.f32.vlgmr.msra.gmra.mrb[0].mxu0 %vm184_vm1, %v180_v3  ;;  %s567_s12 = smov [#allocation5]  }
  0x3f   : > { %p483_p11 = pnand %p482_p8, %p770_p9  ;;  %s485_s25 = sshll.u32 %s567_s12, 4  ;;  %s486_s25 = int_to_ptr.vmem [resolvable:$false] %s485_s25 }
  0x40   : > { %s487_s26 = scalar_lea.vmem %s486_s25, 512  ;;  %p488_p7 = scmp.lt.s32.totalorder %s707_s6, %s486_s25 }
  0x41   : > { %p484_p0 = pneg %p483_p11  ;;  %p489_p13 = scmp.lt.s32.totalorder %s487_s26, %s481_s20 }
  0x43   : > { %p490_p3 = por %p489_p13, %p488_p7 }
  0x45   : > { %p491_p6 = pnand %p490_p3, %p484_p0 }
 0x111   : > { %v259_v4 = vpop.f32.mrb[0].mxu0 }
 0x112   : > { %264 = vst [vmem:[%s177_s21] sm:$0xff] %v259_v4  ;;  %v261_v5 = vpop.f32.mrb[1].mxu0 }
 0x113   : > { %265 = vst [vmem:[%s177_s21 + $0x8] sm:$0xff] %v261_v5 }
 0x114   : > { %494 = shalt.err (!%p491_p6)
}
 0x115   : > { %s495_s27 = scalar_lea.hbm %s712_s18, 256  ;;  %s499_s3 = scalar_lea.hbm %s761_s2, 512 }
 0x116   : > { %p496_p4 = scmp.ne.s32.totalorder %s712_s18, %s495_s27  ;;  %p500_p1 = scmp.lt.u32.totalorder %s712_s18, %s761_s2 }
 0x117   : > { %p501_p2 = scmp.lt.u32.totalorder %s499_s3, %s495_s27  ;;  %p503_p8 = scmp.lt.u32.totalorder %s495_s27, %s712_s18 }
 0x118   : > { %p497_p10 = pnand %p496_p4, %p770_p9 }
 0x119   : > { %p502_p5 = por %p501_p2, %p500_p1 }
 0x11a   : > { %p498_p12 = pneg %p497_p10 }
 0x11b   : > { %p504_p11 = por %p503_p8, %p502_p5 }
 0x11d   : > { %p505_p0 = pnand %p504_p11, %p498_p12 }
 0x11f   : > { %508 = shalt.err (!%p505_p0)
}
 0x120   : > { %389 = dma.vmem_to_hbm [thread:$0]  (%p770_p9), %s707_s6, 256, %s712_s18, %s267_s19  }
 0x121 PF: > { %s295_s4 = sand.u32 1, %s543_s9   ;;  %p771_p7 = scmp.ne.s32.totalorder %s766_s24, 0 }
 0x122   : > { %p772_p13 = scmp.ge.s32.totalorder %s563_s14, 2  ;;  %s296_s5 = scalar_lea.sflag [#allocation4], %s295_s4 }
 0x124   : > { %p396_p3 = pnand %p772_p13, %p771_p7 }
 0x126   : > { %538 = dma.done.wait (!%p396_p3), %s296_s5, 256  }
 0x127   : > { %540 = vsyncadd (!%p396_p3), %s296_s5, 4294967040  ;;  %s18_s14 = sadd.s32 1, %s563_s14   ;;  %s773_s9 = smov %s547_s10 }
 0x128   : > { %p15_p6 = scmp.ge.s32.totalorder %s18_s14, 4   ;;  %s774_s10 = smov %s551_s11 }
 0x129   : > { %s775_s11 = smov %s639_s23  ;;  %s776_s12 = smov %s559_s13 }
 0x12a   : > { %s777_s13 = smov %s779_s17  ;;  %17 = sbr.rel (!%p15_p6) target bundleno = 6 (0x6), region = 73 }
 0x131   :  { %301 = vsyncpa [#allocation3], 1 }
 0x132   :  { %303 = vsyncpa [#allocation3 + $0x1], 1 }
 0x133   :  { %304 = vsyncpa [#allocation4], 1 }
 0x134   :  { %306 = vsyncpa [#allocation4 + $0x1], 1 }

</bundles_post_ra>
